<compile_context>
chip_gen: v5e
topology: v5e:2x2
jax: 0.10.0
libtpu: 0.0.40
codegen_flags: <defaults>
</compile_context>

<pallas_src>
import functools

import jax
import jax.numpy as jnp
from jax import lax
from jax.experimental import pallas as pl
from jax.experimental.pallas import tpu as pltpu

_LANES = 128
_DEFAULT_BLOCK_BYTES = 2 * 1024 * 1024   # ~2 MiB input block (per perf review)
_MIN_KERNEL_ELEMS = 1 << 16              # below this, plain XLA is faster
_VMEM_LIMIT_BYTES = 32 * 1024 * 1024


def _cdiv(a, b):
    return -(-a // b)


def _round_up(a, b):
    return ((a + b - 1) // b) * b


def _device_kind():
    try:
        return jax.devices()[0].device_kind.lower()
    except Exception:
        return ""


def _num_tensorcores():
    # v7x has 2 TensorCores per chip; v5e / v6e have 1.
    return 2 if "v7" in _device_kind() else 1


def _has_low_precision_valu():
    k = _device_kind()
    return ("v6" in k) or ("v7" in k)


def _hinge_kernel(x_ref, o_ref, *, rows, row_tile, fold, tiles_total,
                  tiles_per_core, num_cores, compute_dtype):
    c = pl.program_id(0)
    i = pl.program_id(1)
    logical_tile = (c * tiles_per_core + i) if num_cores > 1 else i

    @pl.when(i == 0)
    def _init():
        o_ref[...] = jnp.zeros_like(o_ref)

    def _fold_add(h32):
        # (row_tile//fold) independent vreg-slab adds into a wide resident
        # accumulator -> short, parallel dependency chains.
        o_ref[...] += h32.reshape(row_tile // fold, fold, _LANES).sum(axis=0)

    def _hinge_full():
        tile = x_ref[...].astype(compute_dtype)
        h = jnp.maximum(tile + 1.0, 0.0).astype(jnp.float32)
        _fold_add(h)

    def _hinge_masked():
        tile = x_ref[...].astype(compute_dtype)
        h = jnp.maximum(tile + 1.0, 0.0).astype(jnp.float32)
        row_ids = logical_tile * row_tile + lax.broadcasted_iota(
            jnp.int32, (row_tile, _LANES), 0)
        # Select, NOT multiply: out-of-range rows are uninitialized VMEM and
        # may hold Inf/NaN; a multiply would produce NaN.
        h = jnp.where(row_ids < rows, h, 0.0)
        _fold_add(h)

    has_partial = (rows % row_tile) != 0                              # static
    has_duplicates = (num_cores * tiles_per_core) > tiles_total       # static

    if has_partial:
        @pl.when(logical_tile < tiles_total - 1)
        def _full():
            _hinge_full()

        @pl.when(logical_tile == tiles_total - 1)
        def _partial():
            _hinge_masked()
        # Clamped duplicate tiles (logical_tile >= tiles_total) fall through
        # both branches and contribute nothing.
    elif has_duplicates:
        @pl.when(logical_tile < tiles_total)
        def _full():
            _hinge_full()
    else:
        _hinge_full()


def hinge_loss(x, y=None, *, block_bytes=_DEFAULT_BLOCK_BYTES,
               min_kernel_elems=_MIN_KERNEL_ELEMS):
    """mean(relu(1 + x)); `y` is accepted and ignored (matches the PyTorch module)."""
    del y
    n = x.size

    # Fast path: small inputs are cheaper as a single fused XLA op.
    if n < min_kernel_elems:
        return jnp.mean(jnp.maximum(1.0 + x.astype(jnp.float32), 0.0))

    itemsize = x.dtype.itemsize
    min_sublane = max(8, 32 // itemsize)          # 8 f32, 16 bf16, 32 int8/fp8
    alignment = min_sublane * _LANES

    flat = x.reshape(-1)
    n_main = (n // alignment) * alignment

    # Ragged tail (< alignment elements): plain jnp, added to kernel partials.
    tail_sum = jnp.float32(0.0)
    if n_main < n:
        tail = flat[n_main:].astype(jnp.float32)
        tail_sum = jnp.sum(jnp.maximum(tail + 1.0, 0.0))

    if n_main == 0:
        return tail_sum / jnp.float32(n)

    rows = n_main // _LANES                       # multiple of min_sublane
    slab = flat[:n_main].reshape(rows, _LANES)

    # Row tile from a byte target so every dtype gets ~block_bytes blocks.
    max_rows = max(min_sublane,
                   (block_bytes // (_LANES * itemsize)) // min_sublane * min_sublane)
    row_tile = min(max_rows, rows)                # multiple of 8 by construction
    fold = max(c for c in (8, 16, 32, 64) if row_tile % c == 0)

    tiles_total = _cdiv(rows, row_tile)
    num_cores = max(1, min(_num_tensorcores(), tiles_total))
    tiles_per_core = _cdiv(tiles_total, num_cores)

    # bf16/f16 math stays in the native dtype on chips with a low-precision
    # VALU (v6e/v7x); accumulation is always f32.
    if (jnp.issubdtype(x.dtype, jnp.floating) and itemsize < 4
            and _has_low_precision_valu()):
        compute_dtype = x.dtype
    else:
        compute_dtype = jnp.float32

    if num_cores > 1:
        def x_index_map(c, i):
            t = c * tiles_per_core + i
            # Clamp so a duplicated tile never DMAs past the array; its
            # compute is skipped in-kernel.
            return (jnp.minimum(t, tiles_total - 1), 0)
    else:
        def x_index_map(c, i):
            return (i, 0)

    kernel = functools.partial(
        _hinge_kernel,
        rows=rows,
        row_tile=row_tile,
        fold=fold,
        tiles_total=tiles_total,
        tiles_per_core=tiles_per_core,
        num_cores=num_cores,
        compute_dtype=compute_dtype,
    )

    def _call(dim_semantics):
        return pl.pallas_call(
            kernel,
            out_shape=jax.ShapeDtypeStruct((num_cores * fold, _LANES), jnp.float32),
            grid_spec=pltpu.PrefetchScalarGridSpec(
                num_scalar_prefetch=0,
                grid=(num_cores, tiles_per_core),
                in_specs=[pl.BlockSpec((row_tile, _LANES), x_index_map)],
                out_specs=pl.BlockSpec((fold, _LANES), lambda c, i: (c, 0)),
            ),
            compiler_params=pltpu.CompilerParams(
                dimension_semantics=dim_semantics,
                vmem_limit_bytes=_VMEM_LIMIT_BYTES,
            ),
            cost_estimate=pl.CostEstimate(
                flops=5 * n_main,            # cast + add + max + mask/fold per elem
                transcendentals=0,
                bytes_accessed=n_main * itemsize + num_cores * fold * _LANES * 4,
            ),
        )(slab)

    if num_cores > 1:
        # Prefer an explicit cross-TensorCore split on multi-core chips (v7x);
        # fall back to plain "parallel" if the lowering rejects CORE_PARALLEL.
        # (Fallback only engages for eager calls; under jit the primary path
        # is expected to compile.)
        try:
            partials = _call((pltpu.CORE_PARALLEL, pltpu.ARBITRARY))
        except Exception:
            partials = _call(("parallel", "arbitrary"))
    else:
        partials = _call(("arbitrary", "arbitrary"))

    total = jnp.sum(partials) + tail_sum
    return total / jnp.float32(n)


if __name__ == "__main__":
    key = jax.random.PRNGKey(0)
    k1, k2, k3 = jax.random.split(key, 3)

    # GAN-discriminator-style logits (small demo shape). Force the kernel path
    # (min_kernel_elems=0) so the Pallas kernel itself is exercised here.
    x1 = jax.random.normal(k1, (2, 4, 16, 16), dtype=jnp.float32)
    y1 = jax.random.normal(k2, (2, 4, 16, 16), dtype=jnp.float32)  # ignored by the loss
    loss1 = hinge_loss(x1, y1, min_kernel_elems=0)
    jax.block_until_ready(loss1)
    ref1 = jnp.mean(jnp.maximum(1.0 + x1, 0.0))
    assert jnp.allclose(loss1, ref1, rtol=1e-5, atol=1e-6), (loss1, ref1)

    # Ragged shape with a small forced block: exercises the multi-tile grid,
    # the masked partial last tile, and the jnp ragged tail.
    x2 = jax.random.normal(k3, (4, 3, 37, 29), dtype=jnp.float32)
    loss2 = hinge_loss(x2, None, min_kernel_elems=0, block_bytes=64 * _LANES * 4)
    jax.block_until_ready(loss2)
    ref2 = jnp.mean(jnp.maximum(1.0 + x2, 0.0))
    assert jnp.allclose(loss2, ref2, rtol=1e-5, atol=1e-6), (loss2, ref2)

    print("KERNEL_OK")
</pallas_src>

<mosaic_0001>
module attributes {stable_mosaic.version = 11 : i64} {
  func.func @_hinge_kernel(%arg0: i32, %arg1: i32, %arg2: memref<16x128xf32, #tpu.memory_space<vmem>>, %arg3: memref<16x128xf32, #tpu.memory_space<vmem>>) attributes {dimension_semantics = [#tpu.dimension_semantics<arbitrary>, #tpu.dimension_semantics<arbitrary>], iteration_bounds = array<i64: 1, 1>, scalar_prefetch = 0 : i64, scratch_operands = 0 : i64, tpu.core_type = #tpu.core_type<tc>, window_params = [{transform_indices = @transform_0, window_bounds = array<i64: 16, 128>}, {transform_indices = @transform_1, window_bounds = array<i64: 16, 128>}]} {
    %c0_i32 = arith.constant 0 : i32
    %0 = arith.cmpi eq, %arg1, %c0_i32 : i32
    %1 = arith.extui %0 : i1 to i32
    %c0_i32_0 = arith.constant 0 : i32
    %2 = arith.cmpi ne, %1, %c0_i32_0 : i32
    scf.if %2 {
      %cst_8 = arith.constant 0.000000e+00 : f32
      %13 = vector.broadcast %cst_8 : f32 to vector<16x128xf32>
      %c0_9 = arith.constant 0 : index
      %c0_10 = arith.constant 0 : index
      %14 = vector.load %arg3[%c0_9, %c0_10] : memref<16x128xf32, #tpu.memory_space<vmem>>, vector<16x128xf32>
      tpu.vector_store %arg3[%c0_9, %c0_10], %13 {strides = array<i32>} : memref<16x128xf32, #tpu.memory_space<vmem>>, vector<16x128xf32>,
    } else {
    }
    %c0 = arith.constant 0 : index
    %c0_1 = arith.constant 0 : index
    %3 = vector.load %arg2[%c0, %c0_1] : memref<16x128xf32, #tpu.memory_space<vmem>>, vector<16x128xf32>
    %cst = arith.constant 1.000000e+00 : f32
    %4 = vector.broadcast %cst : f32 to vector<16x128xf32>
    %5 = arith.addf %3, %4 : vector<16x128xf32>
    %cst_2 = arith.constant 0.000000e+00 : f32
    %6 = vector.broadcast %cst_2 : f32 to vector<16x128xf32>
    %7 = arith.maximumf %5, %6 : vector<16x128xf32>
    %c0_3 = arith.constant 0 : index
    %c0_4 = arith.constant 0 : index
    %8 = vector.load %arg3[%c0_3, %c0_4] : memref<16x128xf32, #tpu.memory_space<vmem>>, vector<16x128xf32>
    %9 = vector.shape_cast %7 : vector<16x128xf32> to vector<1x16x128xf32>
    %cst_5 = arith.constant dense<0.000000e+00> : vector<16x128xf32>
    %10 = vector.multi_reduction <add>, %9, %cst_5 [0] : vector<1x16x128xf32> to vector<16x128xf32>
    %11 = arith.addf %8, %10 : vector<16x128xf32>
    %c0_6 = arith.constant 0 : index
    %c0_7 = arith.constant 0 : index
    %12 = vector.load %arg3[%c0_6, %c0_7] : memref<16x128xf32, #tpu.memory_space<vmem>>, vector<16x128xf32>
    tpu.vector_store %arg3[%c0_6, %c0_7], %11 {strides = array<i32>} : memref<16x128xf32, #tpu.memory_space<vmem>>, vector<16x128xf32>,
    return
  }
  func.func @transform_0(%arg0: i32, %arg1: i32) -> (i32, i32) {
    %c0_i32 = arith.constant 0 : i32
    %c0_i32_0 = arith.constant 0 : i32
    return %arg1, %c0_i32 : i32, i32
  }
  func.func @transform_1(%arg0: i32, %arg1: i32) -> (i32, i32) {
    %c0_i32 = arith.constant 0 : i32
    %c0_i32_0 = arith.constant 0 : i32
    return %arg0, %c0_i32 : i32, i32
  }
}

</mosaic_0001>

<bundles_post_ra>
// kernel: tpu_custom_call.1
= control target key start
LH: loop header
LB: loop body
LE: loop exit
PB: predicated region body
PF: predicated region fallthrough
CT: control target
= control target key end

     0   :  { %6 = vsyncpa [#allocation3], 0  ;;  %s141_s0 = inlined_call_operand.hbm [shape: f32[16,128], index: 0, kind: input, shape index: {}]   ;;  %s142_s1 = inlined_call_operand.hbm [shape: f32[16,128], index: 1, kind: output, shape index: {}]  }
   0x1   :  { %7 = vsyncpa [#allocation4], 0  ;;  %s12_s8 = sshll.u32 %s141_s0, 4  ;;  %s121_s9 = smov [#allocation2]   ;;  %s13_s8 = int_to_ptr.hbm [resolvable:$true] %s12_s8 }
   0x2   :  { %s14_s10 = sshll.u32 %s121_s9, 4  ;;  %s122_s11 = smov 128   ;;  %s15_s10 = int_to_ptr.vmem [resolvable:$true] %s14_s10 }
   0x3   :  { %s123_s12 = smov 8  }
   0x4   :  { %20 = dma.hbm_to_vmem [thread:$0]  %s13_s8, 256, %s15_s10, [#allocation3], %s122_s11, %s122_s11, %s123_s12  }
   0x5   :  { %117 = dma.done.wait [#allocation3], 256  }
   0x6   :  { %118 = vsyncadd [#allocation3], 4294967040  ;;  %v31_v0 = vld [vmem:[#allocation2] sm:$0xff]  ;;  %v32_v1 = vld [vmem:[#allocation2 + $0x8] sm:$0xff]  ;;  %s124_s13 = smov [#allocation5]   ;;  %s51_s0 = sshll.u32 %s142_s1, 4  ;;  %s52_s0 = int_to_ptr.hbm [resolvable:$true] %s51_s0 }
   0x7   :  { %v33_v2 = vadd.f32 1.0, %v31_v0  ;;  %v34_v3 = vadd.f32 1.0, %v32_v1  ;;  %s49_s14 = sshll.u32 %s124_s13, 4  ;;  %s50_s14 = int_to_ptr.vmem [resolvable:$true] %s49_s14 }
   0x9   :  { %v35_v4 = vmax.f32 %v33_v2, 0.0  ;;  %v36_v5 = vmax.f32 %v34_v3, 0.0 }
   0xb   :  { %43 = vst [vmem:[#allocation5] sm:$0xff] %v35_v4 }
   0xc   :  { %44 = vst [vmem:[#allocation5 + $0x8] sm:$0xff] %v36_v5 }
   0xd   :  { %57 = dma.vmem_to_hbm [thread:$0]  %s50_s14, 256, %s52_s0, [#allocation4], %s122_s11, %s122_s11, %s123_s12  }
   0xe   :  { %119 = dma.done.wait [#allocation4], 256  }
   0xf   :  { %120 = vsyncadd [#allocation4], 4294967040 }
  0x10   :  { %62 = vsyncpa [#allocation3], 1 }
  0x11   :  { %63 = vsyncpa [#allocation4], 1 }

</bundles_post_ra>
